<compile_context>
chip_gen: v7x
topology: tpu7x:2x2x1
jax: 0.10.0
libtpu: 0.0.40
codegen_flags: <defaults>
</compile_context>

<pallas_src>
import functools

import jax
import jax.numpy as jnp
from jax.experimental import pallas as pl
from jax.experimental.pallas import tpu as pltpu


def _round_up(x, m):
    return (x + m - 1) // m * m


def _divisor_tile(dim, cap):
    """Largest multiple of 128 that divides `dim` and is <= cap; None if none."""
    best = None
    t = 128
    while t <= min(dim, cap):
        if dim % t == 0:
            best = t
        t += 128
    return best


@functools.lru_cache(maxsize=1)
def _tpu_budget():
    """Generation-aware VMEM budget / M-tile cap (v7x has 64 MiB VMEM, v5e/v6e 128)."""
    vmem = 64 * 1024 * 1024
    try:
        info = pltpu.get_tpu_info()
        vmem = getattr(info, "vmem_capacity_bytes", None) or vmem
    except Exception:
        pass
    if vmem >= 100 * 1024 * 1024:        # v5e / v6e (128 MiB physical)
        return {"tm_max": 1024, "vmem_limit": 96 * 1024 * 1024}
    return {"tm_max": 512, "vmem_limit": 48 * 1024 * 1024}     # v7x (64 MiB)


def _gelu_tanh(x):
    # TODO(synk): HF BERT 'gelu' is the exact erf form; tanh approximation used here.
    return 0.5 * x * (1.0 + jnp.tanh(0.7978845608028654 * (x + 0.044715 * x * x * x)))


# --------------------- fused linear (matmul + epilogue) ---------------------

def _fused_linear_kernel(*refs, activation, has_residual, has_ln, eps):
    i = 0
    x_ref = refs[i]; i += 1
    w_ref = refs[i]; i += 1
    b_ref = refs[i]; i += 1
    res_ref = None
    if has_residual:
        res_ref = refs[i]; i += 1
    g_ref = beta_ref = None
    if has_ln:
        g_ref = refs[i]; i += 1
        beta_ref = refs[i]; i += 1
    o_ref = refs[i]; i += 1
    acc_ref = refs[i]

    k = pl.program_id(2)

    @pl.when(k == 0)
    def _():
        acc_ref[...] = jnp.zeros_like(acc_ref)

    acc_ref[...] += jnp.dot(x_ref[...], w_ref[...],
                            preferred_element_type=jnp.float32)

    @pl.when(k == pl.num_programs(2) - 1)
    def _():
        y = acc_ref[...] + b_ref[...]
        if activation == "gelu":
            y = _gelu_tanh(y)
        elif activation == "tanh":
            y = jnp.tanh(y)
        if has_residual:
            y = y + res_ref[...].astype(jnp.float32)
        if has_ln:
            mu = jnp.mean(y, axis=-1, keepdims=True)
            var = jnp.mean(jnp.square(y - mu), axis=-1, keepdims=True)
            y = (y - mu) * jax.lax.rsqrt(var + eps) * g_ref[...] + beta_ref[...]
        o_ref[...] = y.astype(o_ref.dtype)


def fused_linear(x, w, b2d, *, activation="none", residual=None, ln=None,
                 eps=1e-12, out_dtype=jnp.bfloat16,
                 tm_max=None, tk_max=2048, tn_max=1024):
    """y = epilogue(x @ w + b).  w is pre-transposed [K, N] bf16, b2d is [1, N] f32.

    Optional epilogue: activation ('gelu'/'tanh'), + residual, LayerNorm over N.
    Tiled as grid=(M//tm, N//tn, K//tk), K innermost ("arbitrary"); fp32 VMEM
    accumulator across the K axis.  tk is K itself (or a 128-multiple divisor of K)
    so no K padding happens for BERT dims; tn splits N only when LN is not fused.
    """
    M, K = x.shape
    Kw, N = w.shape
    assert K == Kw

    budget = _tpu_budget()
    if tm_max is None:
        tm_max = budget["tm_max"]

    tm = _round_up(M, 8) if M <= tm_max else tm_max
    m_pad = _round_up(M, tm)

    if K <= tk_max:
        tk, k_pad = K, K
    else:
        tk = _divisor_tile(K, tk_max)
        if tk is not None:
            k_pad = K
        else:  # rare fallback (never hit for BERT dims)
            tk, k_pad = tk_max, _round_up(K, tk_max)

    if ln is not None or N <= tn_max:
        tn = N                      # LN needs the full row; also for small N
    else:
        tn = _divisor_tile(N, tn_max) or N

    x_p = x
    if m_pad != M or k_pad != K:
        x_p = jnp.pad(x, ((0, m_pad - M), (0, k_pad - K)))
    x_p = x_p.astype(jnp.bfloat16)
    # Weights were transposed / cast once in prepare_params; this pad never triggers
    # for the BERT shapes because tk divides K exactly.
    w_p = w if k_pad == K else jnp.pad(w, ((0, k_pad - K), (0, 0)))

    operands = [x_p, w_p, b2d]
    in_specs = [
        pl.BlockSpec((tm, tk), lambda i, j, k: (i, k)),
        pl.BlockSpec((tk, tn), lambda i, j, k: (k, j)),
        pl.BlockSpec((1, tn), lambda i, j, k: (0, j)),
    ]
    if residual is not None:
        res_p = residual if m_pad == M else jnp.pad(residual, ((0, m_pad - M), (0, 0)))
        operands.append(res_p)
        in_specs.append(pl.BlockSpec((tm, tn), lambda i, j, k: (i, j)))
    if ln is not None:
        gamma2d, beta2d = ln
        operands += [gamma2d, beta2d]
        in_specs += [pl.BlockSpec((1, tn), lambda i, j, k: (0, j)),
                     pl.BlockSpec((1, tn), lambda i, j, k: (0, j))]

    out = pl.pallas_call(
        functools.partial(_fused_linear_kernel, activation=activation,
                          has_residual=residual is not None,
                          has_ln=ln is not None, eps=eps),
        out_shape=jax.ShapeDtypeStruct((m_pad, N), out_dtype),
        grid=(m_pad // tm, N // tn, k_pad // tk),
        in_specs=in_specs,
        out_specs=pl.BlockSpec((tm, tn), lambda i, j, k: (i, j)),
        scratch_shapes=[pltpu.VMEM((tm, tn), jnp.float32)],
        compiler_params=pltpu.CompilerParams(
            dimension_semantics=("parallel", "parallel", "arbitrary"),
            vmem_limit_bytes=budget["vmem_limit"]),
    )(*operands)
    return out[:M] if m_pad != M else out


# ------------------------------- layernorm ----------------------------------

def _layernorm_kernel(x_ref, g_ref, b_ref, o_ref, *, eps):
    x = x_ref[...].astype(jnp.float32)
    mu = jnp.mean(x, axis=-1, keepdims=True)
    var = jnp.mean(jnp.square(x - mu), axis=-1, keepdims=True)
    o_ref[...] = ((x - mu) * jax.lax.rsqrt(var + eps) * g_ref[...]
                  + b_ref[...]).astype(o_ref.dtype)


def layernorm_pallas(x2d, gamma2d, beta2d, *, eps=1e-12,
                     out_dtype=jnp.bfloat16, tm_max=512):
    M, H = x2d.shape
    tm = _round_up(M, 8) if M <= tm_max else tm_max
    m_pad = _round_up(M, tm)
    x_p = x2d if m_pad == M else jnp.pad(x2d, ((0, m_pad - M), (0, 0)))
    budget = _tpu_budget()
    out = pl.pallas_call(
        functools.partial(_layernorm_kernel, eps=eps),
        out_shape=jax.ShapeDtypeStruct((m_pad, H), out_dtype),
        grid=(m_pad // tm,),
        in_specs=[pl.BlockSpec((tm, H), lambda i: (i, 0)),
                  pl.BlockSpec((1, H), lambda i: (0, 0)),
                  pl.BlockSpec((1, H), lambda i: (0, 0))],
        out_specs=pl.BlockSpec((tm, H), lambda i: (i, 0)),
        compiler_params=pltpu.CompilerParams(
            dimension_semantics=("parallel",),
            vmem_limit_bytes=budget["vmem_limit"]),
    )(x_p, gamma2d, beta2d)
    return out[:M] if m_pad != M else out


# --------------------------- flash attention ---------------------------------

def _flash_attn_kernel(q_ref, k_ref, v_ref, mask_ref, o_ref,
                       m_sc, l_sc, acc_sc, *, nh, dh):
    ki = pl.program_id(2)

    @pl.when(ki == 0)
    def _():
        m_sc[...] = jnp.full_like(m_sc, -1e30)
        l_sc[...] = jnp.zeros_like(l_sc)
        acc_sc[...] = jnp.zeros_like(acc_sc)

    mask = mask_ref[0]  # (1, tkv) additive bias, f32

    # TODO(synk): per-head lane slices at dh(<128) offsets still cost relayouts for
    # misaligned heads; a full fix (head-padded Q/K lanes) costs ~1.7x QKV FLOPs, so
    # only the scale fold + once-per-tile finalize are applied here.
    for h in range(nh):  # static unroll over heads; per-head 2-D MXU matmuls
        q_h = q_ref[0, :, h * dh:(h + 1) * dh]   # (tq, dh) bf16  (pre-scaled)
        k_h = k_ref[0, :, h * dh:(h + 1) * dh]   # (tkv, dh) bf16
        v_h = v_ref[0, :, h * dh:(h + 1) * dh]   # (tkv, dh) bf16
        # contract on dim 1 of both operands -> no in-kernel transpose
        s = jax.lax.dot_general(q_h, k_h, (((1,), (1,)), ((), ())),
                                preferred_element_type=jnp.float32)
        s = s + mask                              # 1/sqrt(dh) folded into q weights
        m_prev = m_sc[h]                          # (tq, 1)
        m_new = jnp.maximum(m_prev, jnp.max(s, axis=-1, keepdims=True))
        alpha = jnp.exp(m_prev - m_new)
        p = jnp.exp(s - m_new)
        l_sc[h] = alpha * l_sc[h] + jnp.sum(p, axis=-1, keepdims=True)
        acc_sc[h] = alpha * acc_sc[h] + jnp.dot(
            p.astype(v_h.dtype), v_h, preferred_element_type=jnp.float32)
        m_sc[h] = m_new

    @pl.when(ki == pl.num_programs(2) - 1)
    def _():
        parts = [acc_sc[h] * pl.reciprocal(l_sc[h], approx=True) for h in range(nh)]
        o_ref[0] = jnp.concatenate(parts, axis=-1).astype(o_ref.dtype)


def flash_attention_pallas(qkv, mask, *, num_heads, hidden, head_pad):
    """qkv: [B, S, 3*Hp] bf16 packed (Q|K|V lane blocks, each Hp=round_up(H,128) wide,
    Q already scaled by 1/sqrt(dh)); mask: [B, 1, S] additive f32."""
    B, S, _ = qkv.shape
    H, Hp = hidden, head_pad
    dh = H // num_heads

    if S <= 128:
        s_pad = _round_up(S, 8)
        tq = tkv = s_pad
    else:
        s_pad = _round_up(S, 128)
        # Deep KV tiles feed the 256-wide v6e/v7x MXU and cut softmax passes.
        tkv = max(t for t in (512, 384, 256, 128) if s_pad % t == 0)
        tq_cap = 256 if B > 1 else 128   # B==1: keep >=2 q tiles for the v7x megacore
        tq = max(t for t in (256, 128) if s_pad % t == 0 and t <= tq_cap)

    if s_pad != S:
        qkv = jnp.pad(qkv, ((0, 0), (0, s_pad - S), (0, 0)))
        mask = jnp.pad(mask, ((0, 0), (0, 0), (0, s_pad - S)),
                       constant_values=-10000.0)

    budget = _tpu_budget()
    out = pl.pallas_call(
        functools.partial(_flash_attn_kernel, nh=num_heads, dh=dh),
        out_shape=jax.ShapeDtypeStruct((B, s_pad, H), qkv.dtype),
        grid=(B, s_pad // tq, s_pad // tkv),
        in_specs=[
            # Packed QKV passed three times; index_map picks the Q/K/V lane block.
            pl.BlockSpec((1, tq, Hp), lambda b, qi, ki: (b, qi, 0)),
            pl.BlockSpec((1, tkv, Hp), lambda b, qi, ki: (b, ki, 1)),
            pl.BlockSpec((1, tkv, Hp), lambda b, qi, ki: (b, ki, 2)),
            pl.BlockSpec((1, 1, tkv), lambda b, qi, ki: (b, 0, ki)),
        ],
        out_specs=pl.BlockSpec((1, tq, H), lambda b, qi, ki: (b, qi, 0)),
        scratch_shapes=[
            pltpu.VMEM((num_heads, tq, 1), jnp.float32),
            pltpu.VMEM((num_heads, tq, 1), jnp.float32),
            pltpu.VMEM((num_heads, tq, dh), jnp.float32),
        ],
        compiler_params=pltpu.CompilerParams(
            dimension_semantics=("parallel", "parallel", "arbitrary"),
            vmem_limit_bytes=budget["vmem_limit"]),
    )(qkv, qkv, qkv, mask)
    return out[:, :S, :] if s_pad != S else out


# ---------------------------- cross entropy ----------------------------------

def _ce_kernel(logits_ref, labels_ref, w_ref, o_ref, num_sc, den_sc, *, num_classes):
    i = pl.program_id(0)

    @pl.when(i == 0)
    def _():
        num_sc[...] = jnp.zeros_like(num_sc)
        den_sc[...] = jnp.zeros_like(den_sc)

    logits = logits_ref[...].astype(jnp.float32)
    n, c = logits.shape
    ids = jax.lax.broadcasted_iota(jnp.int32, (n, c), 1)
    logits = jnp.where(ids < num_classes, logits, -1e30)  # mask lane padding
    m = jnp.max(logits, axis=-1, keepdims=True)
    lse = jnp.log(jnp.sum(jnp.exp(logits - m), axis=-1, keepdims=True)) + m
    onehot = (ids == labels_ref[...]).astype(jnp.float32)
    picked = jnp.sum(logits * onehot, axis=-1, keepdims=True)
    w = w_ref[...]
    num_sc[...] += jnp.sum(w * (lse - picked))
    den_sc[...] += jnp.sum(w)

    @pl.when(i == pl.num_programs(0) - 1)
    def _():
        # TODO(synk): PyTorch CrossEntropyLoss yields NaN when no valid tokens; we clamp.
        o_ref[...] = num_sc[...] / jnp.maximum(den_sc[...], 1.0)


def cross_entropy_pallas(logits_padded, labels, weights, *, num_classes, tr_max=512):
    """Row-tiled masked mean cross-entropy; logits kept in their native dtype."""
    n, c = logits_padded.shape
    tr = min(_round_up(n, 8), tr_max)
    n_pad = _round_up(n, tr)
    if n_pad != n:
        logits_padded = jnp.pad(logits_padded, ((0, n_pad - n), (0, 0)))
        labels = jnp.pad(labels, (0, n_pad - n))
        weights = jnp.pad(weights, (0, n_pad - n))
    budget = _tpu_budget()
    out = pl.pallas_call(
        functools.partial(_ce_kernel, num_classes=num_classes),
        out_shape=jax.ShapeDtypeStruct((1, 1), jnp.float32),
        grid=(n_pad // tr,),
        in_specs=[pl.BlockSpec((tr, c), lambda i: (i, 0)),
                  pl.BlockSpec((tr, 1), lambda i: (i, 0)),
                  pl.BlockSpec((tr, 1), lambda i: (i, 0))],
        out_specs=pl.BlockSpec((1, 1), lambda i: (0, 0)),
        scratch_shapes=[pltpu.VMEM((1, 1), jnp.float32),
                        pltpu.VMEM((1, 1), jnp.float32)],
        compiler_params=pltpu.CompilerParams(
            dimension_semantics=("arbitrary",),
            vmem_limit_bytes=budget["vmem_limit"]),
    )(logits_padded,
      labels.reshape(-1, 1).astype(jnp.int32),
      weights.reshape(-1, 1).astype(jnp.float32))
    return out[0, 0]


# ----------------------------- Model (glue) ----------------------------------

def init_params(key, cfg):
    """PyTorch-style parameters ([out, in] weights), fp32."""
    H, I, V = cfg["hidden"], cfg["intermediate"], cfg["vocab"]

    def nrm(k, shape):
        return 0.02 * jax.random.normal(k, shape, dtype=jnp.float32)

    keys = iter(jax.random.split(key, 256))
    p = {
        "word_emb": nrm(next(keys), (V, H)),
        "pos_emb": nrm(next(keys), (cfg["max_pos"], H)),
        "tok_emb": nrm(next(keys), (2, H)),
        "emb_ln_g": jnp.ones((H,), jnp.float32),
        "emb_ln_b": jnp.zeros((H,), jnp.float32),
        "layers": [],
    }
    for _ in range(cfg["num_layers"]):
        lp = {
            "q_w": nrm(next(keys), (H, H)), "q_b": jnp.zeros((H,), jnp.float32),
            "k_w": nrm(next(keys), (H, H)), "k_b": jnp.zeros((H,), jnp.float32),
            "v_w": nrm(next(keys), (H, H)), "v_b": jnp.zeros((H,), jnp.float32),
            "ao_w": nrm(next(keys), (H, H)), "ao_b": jnp.zeros((H,), jnp.float32),
            "ao_ln_g": jnp.ones((H,), jnp.float32), "ao_ln_b": jnp.zeros((H,), jnp.float32),
            "i_w": nrm(next(keys), (I, H)), "i_b": jnp.zeros((I,), jnp.float32),
            "o_w": nrm(next(keys), (H, I)), "o_b": jnp.zeros((H,), jnp.float32),
            "o_ln_g": jnp.ones((H,), jnp.float32), "o_ln_b": jnp.zeros((H,), jnp.float32),
        }
        p["layers"].append(lp)
    p["pool_w"] = nrm(next(keys), (H, H))
    p["pool_b"] = jnp.zeros((H,), jnp.float32)
    p["intent_w"] = nrm(next(keys), (cfg["num_intent"], H * max(1, cfg["n_hiddens"])))
    p["intent_b"] = jnp.zeros((cfg["num_intent"],), jnp.float32)
    p["slot_proj_w"] = nrm(next(keys), (cfg["attn_emb"], H))
    p["slot_w"] = nrm(next(keys), (cfg["num_slot"], cfg["attn_emb"]))
    p["slot_b"] = jnp.zeros((cfg["num_slot"],), jnp.float32)
    return p


def prepare_params(p, cfg):
    """One-time: transpose to [in,out], cast to bf16, fuse+scale QKV, fold slot head,
    lane-pad classifier heads.  No per-step weight reshaping remains in the forward."""
    H = cfg["hidden"]
    nh = cfg["num_heads"]
    dh = H // nh
    Hp = _round_up(H, 128)        # Q/K/V lane-block width (== H for real BERT)
    scale = 1.0 / float(dh) ** 0.5

    def wT(w):
        return jnp.transpose(w).astype(jnp.bfloat16)

    def b2d(b):
        return b.reshape(1, -1).astype(jnp.float32)

    pp = {
        "word_emb": p["word_emb"], "pos_emb": p["pos_emb"], "tok_emb": p["tok_emb"],
        "emb_ln_g": b2d(p["emb_ln_g"]), "emb_ln_b": b2d(p["emb_ln_b"]),
        "layers": [], "head_pad": Hp,
    }
    for lp in p["layers"]:
        # Fold the 1/sqrt(dh) attention scale into the Q projection.
        def pad_sec(w_torch, b, s=1.0):
            w_t = jnp.transpose(w_torch) * s            # [H, H]
            w_t = jnp.pad(w_t, ((0, 0), (0, Hp - H)))   # [H, Hp]
            b_p = jnp.pad(b * s, (0, Hp - H))
            return w_t, b_p
        qw, qb = pad_sec(lp["q_w"], lp["q_b"], scale)
        kw, kb = pad_sec(lp["k_w"], lp["k_b"])
        vw, vb = pad_sec(lp["v_w"], lp["v_b"])
        qkv_w = jnp.concatenate([qw, kw, vw], axis=1).astype(jnp.bfloat16)   # [H, 3Hp]
        qkv_b = jnp.concatenate([qb, kb, vb]).reshape(1, -1).astype(jnp.float32)
        pp["layers"].append({
            "qkv_w": qkv_w, "qkv_b": qkv_b,
            "ao_w": wT(lp["ao_w"]), "ao_b": b2d(lp["ao_b"]),
            "ao_ln_g": b2d(lp["ao_ln_g"]), "ao_ln_b": b2d(lp["ao_ln_b"]),
            "i_w": wT(lp["i_w"]), "i_b": b2d(lp["i_b"]),
            "o_w": wT(lp["o_w"]), "o_b": b2d(lp["o_b"]),
            "o_ln_g": b2d(lp["o_ln_g"]), "o_ln_b": b2d(lp["o_ln_b"]),
        })
    pp["pool_w"] = wT(p["pool_w"])
    pp["pool_b"] = b2d(p["pool_b"])

    # Lane-pad classifier heads to 128-lane-dense outputs (sliced back after).
    ni_pad = _round_up(cfg["num_intent"], 128)
    ns_pad = _round_up(cfg["num_slot"], 128)
    iw = jnp.transpose(p["intent_w"]).astype(jnp.float32)          # [Hn, ni]
    pp["intent_w"] = jnp.pad(iw, ((0, 0), (0, ni_pad - iw.shape[1]))).astype(jnp.bfloat16)
    pp["intent_b"] = jnp.pad(p["intent_b"], (0, ni_pad - cfg["num_intent"])).reshape(1, -1)

    # Slot head: proj (no bias, no activation) followed by linear -> fold into one
    # [H, ns] weight (valid since use_intent_context_* are both False).
    proj_T = jnp.transpose(p["slot_proj_w"]).astype(jnp.float32)   # [H, ae]
    slot_T = jnp.transpose(p["slot_w"]).astype(jnp.float32)        # [ae, ns]
    slot_head = proj_T @ slot_T                                    # [H, ns]
    pp["slot_head_w"] = jnp.pad(
        slot_head, ((0, 0), (0, ns_pad - cfg["num_slot"]))).astype(jnp.bfloat16)
    pp["slot_head_b"] = jnp.pad(p["slot_b"], (0, ns_pad - cfg["num_slot"])).reshape(1, -1)
    return pp


def bert_layer(x, mask3d, lp, cfg, head_pad):
    B, S, H = x.shape
    nh = cfg["num_heads"]
    xf = x.reshape(B * S, H)

    # Fused QKV projection: one matmul, x read once; output stays packed [B, S, 3Hp]
    # (no XLA Q/K/V slices - the attention BlockSpecs pick the lane blocks).
    qkv = fused_linear(xf, lp["qkv_w"], lp["qkv_b"])                 # [B*S, 3Hp] bf16
    qkv = qkv.reshape(B, S, 3 * head_pad)

    ctx = flash_attention_pallas(qkv, mask3d, num_heads=nh,
                                 hidden=H, head_pad=head_pad)        # [B, S, H] bf16

    # Attention output proj + residual + LayerNorm fused into one kernel.
    x1 = fused_linear(ctx.reshape(B * S, H), lp["ao_w"], lp["ao_b"],
                      residual=xf, ln=(lp["ao_ln_g"], lp["ao_ln_b"]))
    # FFN: GELU fused into the first matmul; residual + LN fused into the second.
    inter = fused_linear(x1, lp["i_w"], lp["i_b"], activation="gelu")
    x2 = fused_linear(inter, lp["o_w"], lp["o_b"],
                      residual=x1, ln=(lp["o_ln_g"], lp["o_ln_b"]))
    return x2.reshape(B, S, H)


def bert_forward(pp, input_ids, attention_mask, token_type_ids, cfg):
    B, S = input_ids.shape
    H = cfg["hidden"]
    emb = (pp["word_emb"][input_ids]
           + pp["pos_emb"][jnp.arange(S)][None, :, :]
           + pp["tok_emb"][token_type_ids])
    x = layernorm_pallas(emb.reshape(B * S, H),
                         pp["emb_ln_g"], pp["emb_ln_b"]).reshape(B, S, H)
    hidden_states = [x]  # HF: hidden_states[0] is the embedding output
    mask3d = (1.0 - attention_mask.astype(jnp.float32))[:, None, :] * -10000.0
    for lp in pp["layers"]:
        x = bert_layer(x, mask3d, lp, cfg, pp["head_pad"])
        hidden_states.append(x)
    pooler_output = fused_linear(x[:, 0, :], pp["pool_w"], pp["pool_b"],
                                 activation="tanh", out_dtype=jnp.float32)
    return x, pooler_output, hidden_states


def joint_bert_forward(pp, args, cfg, input_ids, attention_mask,
                       token_type_ids, intent_label_ids, slot_labels_ids):
    sequence_output, pooler_output, hidden_states = bert_forward(
        pp, input_ids, attention_mask, token_type_ids, cfg)

    n_hiddens = args["n_hiddens"]
    if n_hiddens >= 1:
        # faithfully preserves the reference's [-i for i in range(n_hiddens)] quirk
        pooled_output = jnp.concatenate(
            [hidden_states[-i][:, 0, :] for i in range(n_hiddens)], axis=-1)
    elif n_hiddens == 0:
        pooled_output = pooler_output
    else:
        mask_exp = attention_mask[:, :, None].astype(jnp.float32)
        pooled_output = (jnp.sum(sequence_output.astype(jnp.float32) * mask_exp, axis=1)
                         / jnp.clip(jnp.sum(mask_exp, axis=1), 1e-9))

    intent_logits_p = fused_linear(pooled_output, pp["intent_w"], pp["intent_b"],
                                   out_dtype=jnp.float32)            # [B, 128]
    intent_logits = intent_logits_p[:, :cfg["num_intent"]]

    # SlotClassifier (use_intent_context_concat=False, use_intent_context_attention=False)
    # -> single folded matmul over B*S rows.
    B, S, H = sequence_output.shape
    sf = sequence_output.reshape(B * S, H)
    slot_logits_p = fused_linear(sf, pp["slot_head_w"], pp["slot_head_b"],
                                 out_dtype=jnp.float32)               # [B*S, 128]
    slot_logits = slot_logits_p[:, :cfg["num_slot"]].reshape(B, S, cfg["num_slot"])

    total_loss = jnp.float32(0.0)
    # intent loss (num_intent_labels > 1 -> CrossEntropy)
    intent_loss = cross_entropy_pallas(
        intent_logits_p, intent_label_ids.reshape(-1),
        jnp.ones((B,), jnp.float32), num_classes=cfg["num_intent"])
    total_loss = total_loss + args["intent_loss_coef"] * intent_loss
    # slot loss: active tokens (attention_mask==1), ignore_index semantics
    mask_flat = attention_mask.reshape(-1).astype(jnp.float32)
    lbl_flat = slot_labels_ids.reshape(-1)
    w = mask_flat * (lbl_flat != args["ignore_index"]).astype(jnp.float32)
    slot_loss = cross_entropy_pallas(slot_logits_p, lbl_flat, w,
                                     num_classes=cfg["num_slot"])
    total_loss = total_loss + (1.0 - args["intent_loss_coef"]) * slot_loss

    # TODO(synk): CRF path (args.use_crf=True) not implemented — no clean Pallas equivalent.
    return (total_loss, (intent_logits, slot_logits), tuple(hidden_states))


# ------------------------------- main ---------------------------------------

if __name__ == "__main__":
    cfg = dict(hidden=32, intermediate=64, num_heads=4, num_layers=2,
               vocab=50, max_pos=16, num_intent=5, num_slot=9,
               attn_emb=32, n_hiddens=1)
    args = dict(n_hiddens=1, intent_loss_coef=0.6, ignore_index=0,
                use_crf=False, use_attention_mask=True, embedding_type="soft")

    B, S = 2, 8
    key = jax.random.PRNGKey(0)
    kp, k1, k2, k3 = jax.random.split(key, 4)
    raw_params = init_params(kp, cfg)
    params = prepare_params(raw_params, cfg)

    input_ids = jax.random.randint(k1, (B, S), 0, cfg["vocab"], dtype=jnp.int32)
    attention_mask = jnp.array([[1] * 8, [1] * 5 + [0] * 3], dtype=jnp.int32)
    token_type_ids = jnp.zeros((B, S), dtype=jnp.int32)
    intent_label_ids = jax.random.randint(k2, (B,), 0, cfg["num_intent"], dtype=jnp.int32)
    slot_labels_ids = jax.random.randint(k3, (B, S), 1, cfg["num_slot"], dtype=jnp.int32)

    total_loss, (intent_logits, slot_logits), hiddens = joint_bert_forward(
        params, args, cfg, input_ids, attention_mask, token_type_ids,
        intent_label_ids, slot_labels_ids)

    jax.block_until_ready(total_loss)
    jax.block_until_ready(intent_logits)
    jax.block_until_ready(slot_logits)
    print("KERNEL_OK")
</pallas_src>

<mosaic_0001>
module attributes {stable_mosaic.version = 11 : i64} {
  func.func @_layernorm_kernel(%arg0: i32, %arg1: memref<16x32xf32, #tpu.memory_space<vmem>>, %arg2: memref<1x32xf32, #tpu.memory_space<vmem>>, %arg3: memref<1x32xf32, #tpu.memory_space<vmem>>, %arg4: memref<16x32xbf16, #tpu.memory_space<vmem>>) attributes {dimension_semantics = [#tpu.dimension_semantics<parallel>], iteration_bounds = array<i64: 1>, scalar_prefetch = 0 : i64, scratch_operands = 0 : i64, tpu.core_type = #tpu.core_type<tc>, window_params = [{transform_indices = @transform_0, window_bounds = array<i64: 16, 32>}, {pipeline_mode = #tpu.pipeline_mode<synchronous>, transform_indices = @transform_1, window_bounds = array<i64: 1, 32>}, {pipeline_mode = #tpu.pipeline_mode<synchronous>, transform_indices = @transform_2, window_bounds = array<i64: 1, 32>}, {transform_indices = @transform_3, window_bounds = array<i64: 16, 32>}]} {
    %c0 = arith.constant 0 : index
    %c0_0 = arith.constant 0 : index
    %0 = vector.load %arg1[%c0, %c0_0] : memref<16x32xf32, #tpu.memory_space<vmem>>, vector<16x32xf32>
    %cst = arith.constant dense<0.000000e+00> : vector<16xf32>
    %1 = vector.multi_reduction <add>, %0, %cst [1] : vector<16x32xf32> to vector<16xf32>
    %2 = vector.shape_cast %1 : vector<16xf32> to vector<16x1xf32>
    %cst_1 = arith.constant 3.200000e+01 : f32
    %3 = vector.broadcast %cst_1 : f32 to vector<16x1xf32>
    %4 = arith.divf %2, %3 : vector<16x1xf32>
    %5 = vector.broadcast %4 : vector<16x1xf32> to vector<16x32xf32>
    %6 = arith.subf %0, %5 : vector<16x32xf32>
    %7 = arith.mulf %6, %6 : vector<16x32xf32>
    %cst_2 = arith.constant dense<0.000000e+00> : vector<16xf32>
    %8 = vector.multi_reduction <add>, %7, %cst_2 [1] : vector<16x32xf32> to vector<16xf32>
    %9 = vector.shape_cast %8 : vector<16xf32> to vector<16x1xf32>
    %cst_3 = arith.constant 3.200000e+01 : f32
    %10 = vector.broadcast %cst_3 : f32 to vector<16x1xf32>
    %11 = arith.divf %9, %10 : vector<16x1xf32>
    %12 = vector.broadcast %4 : vector<16x1xf32> to vector<16x32xf32>
    %13 = arith.subf %0, %12 : vector<16x32xf32>
    %cst_4 = arith.constant 9.99999996E-13 : f32
    %14 = vector.broadcast %cst_4 : f32 to vector<16x1xf32>
    %15 = arith.addf %11, %14 : vector<16x1xf32>
    %16 = math.rsqrt %15 : vector<16x1xf32>
    %17 = vector.broadcast %16 : vector<16x1xf32> to vector<16x32xf32>
    %18 = arith.mulf %13, %17 : vector<16x32xf32>
    %c0_5 = arith.constant 0 : index
    %c0_6 = arith.constant 0 : index
    %19 = vector.load %arg2[%c0_5, %c0_6] : memref<1x32xf32, #tpu.memory_space<vmem>>, vector<1x32xf32>
    %20 = vector.broadcast %19 : vector<1x32xf32> to vector<16x32xf32>
    %21 = arith.mulf %18, %20 : vector<16x32xf32>
    %c0_7 = arith.constant 0 : index
    %c0_8 = arith.constant 0 : index
    %22 = vector.load %arg3[%c0_7, %c0_8] : memref<1x32xf32, #tpu.memory_space<vmem>>, vector<1x32xf32>
    %23 = vector.broadcast %22 : vector<1x32xf32> to vector<16x32xf32>
    %24 = arith.addf %21, %23 : vector<16x32xf32>
    %25 = arith.truncf %24 : vector<16x32xf32> to vector<16x32xbf16>
    %c0_9 = arith.constant 0 : index
    %c0_10 = arith.constant 0 : index
    %26 = vector.load %arg4[%c0_9, %c0_10] : memref<16x32xbf16, #tpu.memory_space<vmem>>, vector<16x32xbf16>
    tpu.vector_store %arg4[%c0_9, %c0_10], %25 {strides = array<i32>} : memref<16x32xbf16, #tpu.memory_space<vmem>>, vector<16x32xbf16>,
    return
  }
  func.func @transform_0(%arg0: i32) -> (i32, i32) {
    %c0_i32 = arith.constant 0 : i32
    %c0_i32_0 = arith.constant 0 : i32
    return %arg0, %c0_i32 : i32, i32
  }
  func.func @transform_1(%arg0: i32) -> (i32, i32) {
    %c0_i32 = arith.constant 0 : i32
    %c0_i32_0 = arith.constant 0 : i32
    %c0_i32_1 = arith.constant 0 : i32
    return %c0_i32, %c0_i32_0 : i32, i32
  }
  func.func @transform_2(%arg0: i32) -> (i32, i32) {
    %c0_i32 = arith.constant 0 : i32
    %c0_i32_0 = arith.constant 0 : i32
    %c0_i32_1 = arith.constant 0 : i32
    return %c0_i32, %c0_i32_0 : i32, i32
  }
  func.func @transform_3(%arg0: i32) -> (i32, i32) {
    %c0_i32 = arith.constant 0 : i32
    %c0_i32_0 = arith.constant 0 : i32
    return %arg0, %c0_i32 : i32, i32
  }
}

</mosaic_0001>

<bundles_post_ra>
// kernel: tpu_custom_call.1
= control target key start
LH: loop header
LB: loop body
LE: loop exit
PB: predicated region body
PF: predicated region fallthrough
CT: control target
= control target key end

     0   :  { %8 = vsyncpa [#allocation3], 0  ;;  %s229_s0 = inlined_call_operand.hbm [shape: f32[16,32], index: 0, kind: input, shape index: {}]   ;;  %s230_s1 = inlined_call_operand.vmem [shape: f32[1,32], index: 1, kind: input, shape index: {}]   ;;  %s231_s2 = inlined_call_operand.vmem [shape: f32[1,32], index: 2, kind: input, shape index: {}]   ;;  %s232_s3 = inlined_call_operand.hbm [shape: bf16[16,32], index: 3, kind: output, shape index: {}]  }
   0x1   :  { %9 = vsyncpa [#allocation4], 0  ;;  %s169_s12 = smov [#allocation2]   ;;  %s121_s16 = scalar_lea.hbm %s229_s0, 256 }
   0x2   :  { %s15_s13 = sshll.u32 %s169_s12, 4  ;;  %p122_p0 = scmp.ne.s32.totalorder %s229_s0, %s121_s16  ;;  %s16_s13 = int_to_ptr.vmem [resolvable:$true] %s15_s13 }
   0x3   :  { %p125_p1 = scmp.lt.u32.totalorder %s121_s16, %s229_s0 }
   0x5   :  { %p127_p2 = pnand %p125_p1, %p122_p0 }
   0x7   :  { %130 = shalt.err (!%p127_p2)
}
   0x8   :  { %s131_s21 = scalar_lea.vmem %s16_s13, 256  ;;  %p136_p4 = scmp.lt.s32.totalorder %s16_s13, %s16_s13 }
   0x9   :  { %p132_p3 = scmp.ne.s32.totalorder %s16_s13, %s131_s21  ;;  %p137_p5 = scmp.lt.s32.totalorder %s131_s21, %s131_s21 }
   0xb   :  { %p138_p6 = por %p137_p5, %p136_p4 }
   0xd   :  { %p139_p7 = pnand %p138_p6, %p132_p3 }
   0xf   :  { %142 = shalt.err (!%p139_p7)
}
  0x10   :  { %s170_s22 = smov 128   ;;  %s171_s23 = smov 8  }
  0x11   :  { %21 = dma.hbm_to_vmem [thread:$0]  %s229_s0, 256, %s16_s13, [#allocation3], %s170_s22, %s170_s22, %s171_s23  }
  0x12   :  { %165 = dma.done.wait [#allocation3], 256  }
  0x13   :  { %166 = vsyncadd [#allocation3], 4294967040  ;;  %vm31_vm0 = vcmask 261120   ;;  %v29_v0 = vld [vmem:[#allocation2] sm:$0xff]  ;;  %v30_v1 = vld [vmem:[#allocation2 + $0x8] sm:$0xff]  ;;  %vm85_vm1 = vcmask 257024  }
  0x14   :  { %v32_v2 = vsel %vm31_vm0, %v29_v0, 0.0  ;;  %v35_v3 = vsel %vm31_vm0, %v30_v1, 0.0  ;;  %v105_v21 = vld [vmem:[%s230_s1] ss:$0 sm:$0xff]  ;;  %s172_s29 = smov [#allocation5]  }
  0x15   :  { %33 = vadd.xlane.f32.xlu0 %v32_v2  ;;  %v106_v23 = vld [vmem:[%s231_s2] ss:$0 sm:$0xff]  ;;  %s93_s30 = sshll.u32 %s172_s29, 4  ;;  %s94_s30 = int_to_ptr.vmem [resolvable:$true] %s93_s30 }
  0x16   :  { %s143_s1 = scalar_lea.vmem %s94_s30, 128  ;;  %p148_p9 = scmp.lt.s32.totalorder %s94_s30, %s94_s30 }
  0x17   :  { %p144_p8 = scmp.ne.s32.totalorder %s94_s30, %s143_s1  ;;  %p149_p10 = scmp.lt.s32.totalorder %s143_s1, %s143_s1 }
  0x19   :  { %36 = vadd.xlane.f32.xlu0 %v35_v3  ;;  %p150_p11 = por %p149_p10, %p148_p9 }
  0x1b   :  { %p151_p12 = pnand %p150_p11, %p144_p8 }
  0xa2   :  { %v34_v4 = vpop.xlane.xlu0 %33 }
  0xa3   :  { %v39_v5 = vmul.f32 0.03125, %v34_v4 }
  0xa5   :  { %v41_v6 = vsub.f32 %v29_v0, %v39_v5 }
  0xa6   :  { %v37_v7 = vpop.xlane.xlu0 %36 }
  0xa7   :  { %v40_v8 = vmul.f32 0.03125, %v37_v7  ;;  %v43_v9 = vmul.f32 %v41_v6, %v41_v6 }
  0xa9   :  { %v42_v10 = vsub.f32 %v30_v1, %v40_v8  ;;  %v45_v11 = vsel %vm31_vm0, %v43_v9, 0.0 }
  0xaa   :  { %46 = vadd.xlane.f32.xlu1 %v45_v11 }
  0xab   :  { %v44_v12 = vmul.f32 %v42_v10, %v42_v10 }
  0xad   :  { %v48_v13 = vsel %vm31_vm0, %v44_v12, 0.0 }
  0xae   :  { %49 = vadd.xlane.f32.xlu1 %v48_v13 }
 0x137   :  { %v47_v14 = vpop.xlane.xlu1 %46 }
 0x138   :  { %v51_v15 = vmul.f32 0.03125, %v47_v14 }
 0x13a   :  { %v53_v16 = vadd.f32 1e-12, %v51_v15 }
 0x13b   :  { %v50_v17 = vpop.xlane.xlu1 %49 }
 0x13c   :  { %117 = vrsqrt.f32 %v53_v16  ;;  %v52_v18 = vmul.f32 0.03125, %v50_v17 }
 0x13e   :  { %v54_v19 = vadd.f32 1e-12, %v52_v18 }
 0x140   :  { %119 = vrsqrt.f32 %v54_v19 }
 0x146   :  { %v118_v20 = vpop.eup %117 }
 0x147   :  { %v57_v22 = vmul.f32 %v118_v20, %v41_v6 }
 0x149   :  { %v66_v24 = vmul.f32 %v105_v21, %v57_v22 }
 0x14a   :  { %v120_v25 = vpop.eup %119 }
 0x14b   :  { %v58_v26 = vmul.f32 %v120_v25, %v42_v10  ;;  %v75_v27 = vadd.f32 %v106_v23, %v66_v24 }
 0x14d   :  { %v67_v28 = vmul.f32 %v105_v21, %v58_v26  ;;  %v109_v29 = vpack.c.bf16 %v75_v27, %v75_v27 }
 0x14f   :  { %v76_v30 = vadd.f32 %v106_v23, %v67_v28  ;;  %86 = vst.msk [vmem:[#allocation5] sm:$0xf] %vm85_vm1, %v109_v29 }
 0x151   :  { %v110_v31 = vpack.c.bf16 %v76_v30, %v76_v30 }
 0x153   :  { %87 = vst.msk [vmem:[#allocation5 + $0x4] sm:$0xf] %vm85_vm1, %v110_v31 }
 0x154   :  { %154 = shalt.err (!%p151_p12)
}
 0x155   :  { %s155_s5 = scalar_lea.hbm %s232_s3, 128 }
 0x156   :  { %p156_p13 = scmp.ne.s32.totalorder %s232_s3, %s155_s5  ;;  %p159_p0 = scmp.lt.u32.totalorder %s155_s5, %s232_s3 }
 0x158   :  { %p161_p1 = pnand %p159_p0, %p156_p13 }
 0x15a   :  { %164 = shalt.err (!%p161_p1)
}
 0x15b   :  { %s173_s10 = smov 64   ;;  %s174_s11 = smov 4  }
 0x15c   :  { %99 = dma.vmem_to_hbm [thread:$0]  %s94_s30, 128, %s232_s3, [#allocation4], %s173_s10, %s173_s10, %s174_s11  }
 0x15d   :  { %167 = dma.done.wait [#allocation4], 128  }
 0x15e   :  { %168 = vsyncadd [#allocation4], 4294967168 }
 0x15f   :  { %103 = vsyncpa [#allocation3], 1 }
 0x160   :  { %104 = vsyncpa [#allocation4], 1 }

</bundles_post_ra>
